<compile_context>
chip_gen: v5e
topology: v5e:2x2
jax: 0.10.0
libtpu: 0.0.40
codegen_flags: <defaults>
</compile_context>

<pallas_src>
import functools

import jax
import jax.numpy as jnp
from jax.experimental import pallas as pl
from jax.experimental.pallas import tpu as pltpu


def _round_up(x: int, m: int) -> int:
    return ((x + m - 1) // m) * m


def _tensorcores_per_chip() -> int:
    """Best-effort detection of TensorCores per chip (v7x has 2, v5e/v6e 1)."""
    try:
        kind = jax.devices()[0].device_kind.lower()
        if "v7" in kind:
            return 2
    except Exception:
        pass
    return 1


def _pick_row_tile(B: int, H: int, n_fused: int, in_itemsize: int,
                   n_cores: int) -> int:
    """Row tile from a VMEM budget; split across TensorCores when possible."""
    # Double-buffered activation tile (param dtype) + two f32 output tiles.
    vmem_budget = 8 * 1024 * 1024
    bytes_per_row = 2 * (H * in_itemsize + n_fused * 4)
    tb_cap = max(8, min(2048, (vmem_budget // max(1, bytes_per_row)) // 8 * 8))
    # >= n_cores grid steps when B is large enough (v7x megacore), otherwise
    # one big step (v5e/v6e: serial grid, ~0.35us fixed cost per step).
    tb = _round_up(max(1, -(-B // n_cores)), 8)
    return max(8, min(tb, tb_cap))


def _gaussian_fused_kernel(h_ref, w_ref, b_ref, mu_ref, sigma_ref, *, O):
    # h_ref : (TB, H)   w_ref : (H, 2*O)   b_ref : (1, 2*O)
    # mu_ref, sigma_ref : (TB, O)
    # Single fused MXU matmul for both heads, f32 accumulate.
    y = jnp.dot(h_ref[...], w_ref[...], preferred_element_type=jnp.float32)
    y = y + b_ref[...].astype(jnp.float32)                       # (1, 2*O) broadcast

    # mu head: identity on lanes [0, O).
    mu_ref[...] = y[:, :O].astype(mu_ref.dtype)

    # sigma head: stabilized softplus on lanes [O, 2*O):
    #   max(s,0) + log1p(exp(-|s|)) + 1e-6  (no overflow, strictly positive)
    s = y[:, O:2 * O]
    sigma = jnp.maximum(s, 0.0) + jnp.log1p(jnp.exp(-jnp.abs(s))) + 1e-6
    sigma_ref[...] = sigma.astype(sigma_ref.dtype)


def prepare_gaussian_params(w_mu, b_mu, w_sigma, b_sigma,
                            param_dtype=jnp.float32):
    """Do ONCE at model init. w_*: PyTorch layout (O, H); b_*: (O,).

    Returns (w_fused, b_fused, O): the (H, 2*O) fused+transposed weight (in
    `param_dtype`; use bf16 for large H to halve weight/activation bytes) and
    the (1, 2*O) fused bias (kept f32; added after f32 accumulation).
    """
    O, H = w_mu.shape
    w_fused = jnp.concatenate(
        [jnp.asarray(w_mu, jnp.float32).T, jnp.asarray(w_sigma, jnp.float32).T],
        axis=1).astype(param_dtype)                               # (H, 2*O)
    b_fused = jnp.concatenate(
        [jnp.asarray(b_mu, jnp.float32), jnp.asarray(b_sigma, jnp.float32)],
        axis=0).reshape(1, 2 * O).astype(jnp.float32)             # (1, 2*O)
    return w_fused, b_fused, O


def gaussian_forward_prepared(h, w_fused, b_fused, O):
    """Fast path: params already fused/transposed (no per-call re-layout)."""
    h = jnp.asarray(h).astype(w_fused.dtype)   # match weight dtype (f32 or bf16)
    B, H = h.shape
    n_fused = w_fused.shape[1]

    n_cores = _tensorcores_per_chip()
    TB = _pick_row_tile(B, H, n_fused, jnp.dtype(h.dtype).itemsize, n_cores)
    grid = (pl.cdiv(B, TB),)   # ragged last block masked by Pallas; no jnp.pad

    mu, sigma = pl.pallas_call(
        functools.partial(_gaussian_fused_kernel, O=O),
        out_shape=(
            jax.ShapeDtypeStruct((B, O), jnp.float32),
            jax.ShapeDtypeStruct((B, O), jnp.float32),
        ),
        grid_spec=pltpu.PrefetchScalarGridSpec(
            num_scalar_prefetch=0,
            grid=grid,
            in_specs=[
                pl.BlockSpec((TB, H), lambda i: (i, 0)),          # activations
                pl.BlockSpec((H, n_fused), lambda i: (0, 0)),     # fused weight
                pl.BlockSpec((1, n_fused), lambda i: (0, 0)),     # fused bias
            ],
            out_specs=[
                pl.BlockSpec((TB, O), lambda i: (i, 0)),          # mu
                pl.BlockSpec((TB, O), lambda i: (i, 0)),          # sigma
            ],
        ),
        compiler_params=pltpu.CompilerParams(
            dimension_semantics=("parallel",),
            vmem_limit_bytes=32 * 1024 * 1024,
        ),
    )(h, w_fused, b_fused)

    # Reproduce torch's .squeeze(0): only drops the dim when batch == 1.
    if B == 1:
        mu, sigma = mu[0], sigma[0]
    return mu, sigma


def gaussian_forward(h, w_mu, b_mu, w_sigma, b_sigma):
    """Convenience wrapper taking raw PyTorch-layout params.

    For a decode loop, call prepare_gaussian_params ONCE and reuse
    gaussian_forward_prepared instead (avoids per-call weight re-layout).
    """
    w_fused, b_fused, O = prepare_gaussian_params(w_mu, b_mu, w_sigma, b_sigma)
    return gaussian_forward_prepared(h, w_fused, b_fused, O)


if __name__ == "__main__":
    batch, hidden, output = 8, 32, 16

    key = jax.random.PRNGKey(0)
    k_h, k_wm, k_bm, k_ws, k_bs = jax.random.split(key, 5)

    # Deterministic init mimicking nn.Linear's U(-1/sqrt(fan_in), 1/sqrt(fan_in))
    bound = 1.0 / jnp.sqrt(hidden)
    h = jax.random.normal(k_h, (batch, hidden), dtype=jnp.float32)
    w_mu = jax.random.uniform(k_wm, (output, hidden), minval=-bound, maxval=bound)
    b_mu = jax.random.uniform(k_bm, (output,), minval=-bound, maxval=bound)
    w_sg = jax.random.uniform(k_ws, (output, hidden), minval=-bound, maxval=bound)
    b_sg = jax.random.uniform(k_bs, (output,), minval=-bound, maxval=bound)

    # Hoisted param prep (done once), then the per-call fast path.
    w_fused, b_fused, O = prepare_gaussian_params(w_mu, b_mu, w_sg, b_sg)
    mu_t, sigma_t = gaussian_forward_prepared(h, w_fused, b_fused, O)
    jax.block_until_ready((mu_t, sigma_t))

    # Reference check in plain JAX (stable softplus, same formula as torch).
    mu_ref = h @ w_mu.T + b_mu
    sg_ref = jax.nn.softplus(h @ w_sg.T + b_sg) + 1e-6
    assert mu_t.shape == (batch, output) and sigma_t.shape == (batch, output)
    assert jnp.allclose(mu_t, mu_ref, atol=1e-5), "mu mismatch"
    assert jnp.allclose(sigma_t, sg_ref, atol=1e-5), "sigma mismatch"
    assert jnp.all(sigma_t > 0.0), "sigma must be positive"

    # Ragged-batch path (no wrapper padding; Pallas masks the partial block).
    mu_r, sg_r = gaussian_forward_prepared(h[:5], w_fused, b_fused, O)
    jax.block_until_ready((mu_r, sg_r))
    assert mu_r.shape == (5, output)
    assert jnp.allclose(mu_r, mu_ref[:5], atol=1e-5)
    assert jnp.allclose(sg_r, sg_ref[:5], atol=1e-5)

    # batch == 1 path: torch's .squeeze(0) drops the leading dim.
    mu_1, sg_1 = gaussian_forward_prepared(h[:1], w_fused, b_fused, O)
    jax.block_until_ready((mu_1, sg_1))
    assert mu_1.shape == (output,) and sg_1.shape == (output,)
    assert jnp.allclose(mu_1, mu_ref[0], atol=1e-5)
    assert jnp.allclose(sg_1, sg_ref[0], atol=1e-5)

    print("KERNEL_OK")
</pallas_src>

<mosaic_0001>
module attributes {stable_mosaic.version = 11 : i64} {
  func.func @_gaussian_fused_kernel(%arg0: i32, %arg1: memref<8x32xf32, #tpu.memory_space<vmem>>, %arg2: memref<32x32xf32, #tpu.memory_space<vmem>>, %arg3: memref<1x32xf32, #tpu.memory_space<vmem>>, %arg4: memref<8x16xf32, #tpu.memory_space<vmem>>, %arg5: memref<8x16xf32, #tpu.memory_space<vmem>>) attributes {dimension_semantics = [#tpu.dimension_semantics<parallel>], iteration_bounds = array<i64: 1>, scalar_prefetch = 0 : i64, scratch_operands = 0 : i64, tpu.core_type = #tpu.core_type<tc>, window_params = [{transform_indices = @transform_0, window_bounds = array<i64: 8, 32>}, {pipeline_mode = #tpu.pipeline_mode<synchronous>, transform_indices = @transform_1, window_bounds = array<i64: 32, 32>}, {pipeline_mode = #tpu.pipeline_mode<synchronous>, transform_indices = @transform_2, window_bounds = array<i64: 1, 32>}, {transform_indices = @transform_3, window_bounds = array<i64: 8, 16>}, {transform_indices = @transform_4, window_bounds = array<i64: 8, 16>}]} {
    %c0 = arith.constant 0 : index
    %c0_0 = arith.constant 0 : index
    %0 = vector.load %arg1[%c0, %c0_0] : memref<8x32xf32, #tpu.memory_space<vmem>>, vector<8x32xf32>
    %c0_1 = arith.constant 0 : index
    %c0_2 = arith.constant 0 : index
    %1 = vector.load %arg2[%c0_1, %c0_2] : memref<32x32xf32, #tpu.memory_space<vmem>>, vector<32x32xf32>
    %cst = arith.constant dense<0.000000e+00> : vector<8x32xf32>
    %2 = tpu.matmul %0, %1, %cst {dimension_numbers = #tpu.dot_dimension_numbers<[1], [0], [0], [1], [0, 0, 1, 1], [], []>} : vector<8x32xf32>, vector<32x32xf32>, vector<8x32xf32> -> vector<8x32xf32>
    %c0_3 = arith.constant 0 : index
    %c0_4 = arith.constant 0 : index
    %3 = vector.load %arg3[%c0_3, %c0_4] : memref<1x32xf32, #tpu.memory_space<vmem>>, vector<1x32xf32>
    %4 = vector.broadcast %3 : vector<1x32xf32> to vector<8x32xf32>
    %5 = arith.addf %2, %4 : vector<8x32xf32>
    %6 = vector.extract_strided_slice %5 {offsets = [0, 0], sizes = [8, 16], strides = [1, 1]} : vector<8x32xf32> to vector<8x16xf32>
    %c0_5 = arith.constant 0 : index
    %c0_6 = arith.constant 0 : index
    %7 = vector.load %arg4[%c0_5, %c0_6] : memref<8x16xf32, #tpu.memory_space<vmem>>, vector<8x16xf32>
    tpu.vector_store %arg4[%c0_5, %c0_6], %6 {strides = array<i32>} : memref<8x16xf32, #tpu.memory_space<vmem>>, vector<8x16xf32>,
    %8 = vector.extract_strided_slice %5 {offsets = [0, 16], sizes = [8, 16], strides = [1, 1]} : vector<8x32xf32> to vector<8x16xf32>
    %cst_7 = arith.constant 0.000000e+00 : f32
    %9 = vector.broadcast %cst_7 : f32 to vector<8x16xf32>
    %10 = arith.maximumf %8, %9 : vector<8x16xf32>
    %11 = math.absf %8 : vector<8x16xf32>
    %cst_8 = arith.constant 0.000000e+00 : f32
    %12 = vector.broadcast %cst_8 : f32 to vector<8x16xf32>
    %13 = arith.subf %12, %11 : vector<8x16xf32>
    %14 = math.exp %13 : vector<8x16xf32>
    %15 = math.log1p %14 : vector<8x16xf32>
    %16 = arith.addf %10, %15 : vector<8x16xf32>
    %cst_9 = arith.constant 9.99999997E-7 : f32
    %17 = vector.broadcast %cst_9 : f32 to vector<8x16xf32>
    %18 = arith.addf %16, %17 : vector<8x16xf32>
    %c0_10 = arith.constant 0 : index
    %c0_11 = arith.constant 0 : index
    %19 = vector.load %arg5[%c0_10, %c0_11] : memref<8x16xf32, #tpu.memory_space<vmem>>, vector<8x16xf32>
    tpu.vector_store %arg5[%c0_10, %c0_11], %18 {strides = array<i32>} : memref<8x16xf32, #tpu.memory_space<vmem>>, vector<8x16xf32>,
    return
  }
  func.func @transform_0(%arg0: i32) -> (i32, i32) {
    %c0_i32 = arith.constant 0 : i32
    %c0_i32_0 = arith.constant 0 : i32
    return %arg0, %c0_i32 : i32, i32
  }
  func.func @transform_1(%arg0: i32) -> (i32, i32) {
    %c0_i32 = arith.constant 0 : i32
    %c0_i32_0 = arith.constant 0 : i32
    %c0_i32_1 = arith.constant 0 : i32
    return %c0_i32, %c0_i32_0 : i32, i32
  }
  func.func @transform_2(%arg0: i32) -> (i32, i32) {
    %c0_i32 = arith.constant 0 : i32
    %c0_i32_0 = arith.constant 0 : i32
    %c0_i32_1 = arith.constant 0 : i32
    return %c0_i32, %c0_i32_0 : i32, i32
  }
  func.func @transform_3(%arg0: i32) -> (i32, i32) {
    %c0_i32 = arith.constant 0 : i32
    %c0_i32_0 = arith.constant 0 : i32
    return %arg0, %c0_i32 : i32, i32
  }
  func.func @transform_4(%arg0: i32) -> (i32, i32) {
    %c0_i32 = arith.constant 0 : i32
    %c0_i32_0 = arith.constant 0 : i32
    return %arg0, %c0_i32 : i32, i32
  }
}

</mosaic_0001>

<bundles_post_ra>
// kernel: tpu_custom_call.1
= control target key start
LH: loop header
LB: loop body
LE: loop exit
PB: predicated region body
PF: predicated region fallthrough
CT: control target
= control target key end

     0   :  { %10 = vsyncpa [#allocation3], 0  ;;  %s304_s0 = inlined_call_operand.hbm [shape: f32[8,32], index: 0, kind: input, shape index: {}]   ;;  %s305_s1 = inlined_call_operand.hbm [shape: f32[32,32], index: 1, kind: input, shape index: {}]   ;;  %s306_s2 = inlined_call_operand.vmem [shape: f32[1,32], index: 2, kind: input, shape index: {}]   ;;  %s307_s3 = inlined_call_operand.hbm [shape: f32[8,16], index: 3, kind: output, shape index: {0}]   ;;  %s308_s4 = inlined_call_operand.hbm [shape: f32[8,16], index: 4, kind: output, shape index: {1}]  }
   0x1   :  { %11 = vsyncpa [#allocation6], 0 }
   0x2   :  { %12 = vsyncpa [#allocation4], 0 }
   0x3   :  { %13 = vsyncpa [#allocation9], 0  ;;  %s19_s17 = sshll.u32 %s304_s0, 4  ;;  %s255_s18 = smov [#allocation2]   ;;  %s20_s17 = int_to_ptr.hbm [resolvable:$true] %s19_s17 }
   0x4   :  { %s21_s19 = sshll.u32 %s255_s18, 4  ;;  %s29_s22 = sshll.u32 %s305_s1, 4  ;;  %s22_s19 = int_to_ptr.vmem [resolvable:$true] %s21_s19  ;;  %s30_s22 = int_to_ptr.hbm [resolvable:$true] %s29_s22 }
   0x5   :  { %24 = dma.hbm_to_vmem [thread:$0]  %s20_s17, 128, %s22_s19, [#allocation3]  }
   0x6   :  { %s256_s23 = smov [#allocation5]   ;;  %s257_s25 = smov 128  }
   0x7   :  { %s31_s24 = sshll.u32 %s256_s23, 4  ;;  %s258_s26 = smov 8   ;;  %s32_s24 = int_to_ptr.vmem [resolvable:$true] %s31_s24 }
   0x8   :  { %37 = dma.hbm_to_vmem [thread:$0]  %s30_s22, 512, %s32_s24, [#allocation6], %s257_s25, %s257_s25, %s258_s26  }
   0x9   :  { %247 = dma.done.wait [#allocation3], 128  }
   0xa   :  { %248 = vsyncadd [#allocation3], 4294967168 }
   0xb   :  { %249 = dma.done.wait [#allocation6], 512  }
   0xc   :  { %250 = vsyncadd [#allocation6], 4294966784  ;;  %v52_v0 = vld [vmem:[#allocation5 + $0x18] sm:$0xff]  ;;  %v51_v1 = vld [vmem:[#allocation5 + $0x10] sm:$0xff]  ;;  %vm57_vm0 = vcmask 261120   ;;  %vm81_vm1 = vcmask 130048  }
   0xd   :  { %73 = vmatpush.msra.mxu0 %v52_v0  ;;  %v50_v2 = vld [vmem:[#allocation5 + $0x8] sm:$0xff]  ;;  %v49_v3 = vld [vmem:[#allocation5] sm:$0xff]  ;;  %v48_v4 = vld [vmem:[#allocation2] sm:$0xff]  ;;  %s259_s27 = smov [#allocation7]   ;;  %s111_s5 = sshll.u32 %s307_s3, 4  ;;  %s112_s5 = int_to_ptr.hbm [resolvable:$true] %s111_s5 }
   0xe   :  { %v146_v5 = vld [vmem:[%s306_s2] ss:$0 sm:$0xff]  ;;  %s109_s28 = sshll.u32 %s259_s27, 4  ;;  %s260_s2 = smov 112   ;;  %s110_s28 = int_to_ptr.vmem [resolvable:$true] %s109_s28 }
   0xf   :  { %74 = vmatpush.msra.mxu0 %v51_v1  ;;  %s261_s6 = smov [#allocation8]   ;;  %s122_s3 = sshll.u32 %s308_s4, 4  ;;  %s123_s3 = int_to_ptr.hbm [resolvable:$true] %s122_s3 }
  0x10   :  { %s120_s7 = sshll.u32 %s261_s6, 4  ;;  %s121_s7 = int_to_ptr.vmem [resolvable:$true] %s120_s7 }
  0x11   :  { %75 = vmatpush.msra.mxu0 %v50_v2 }
  0x13   :  { %76 = vmatpush.msra.mxu0 %v49_v3 }
  0x14   :  { %138 = vmatmul.msk.f32.vlgmr.msra.gmra.mxu0 %vm57_vm0, %v48_v4 }
  0x91   :  { %v78_v6 = vpop.f32.mrf.mxu0 }
  0x92   :  { %v79_v7 = vadd.f32 %v146_v5, %v78_v6 }
  0x94   :  { %v84_v8 = vand.u32 2147483647, %v79_v7  ;;  %82 = vst.msk [vmem:[#allocation7] sm:$0xff] %vm81_vm1, %v79_v7  ;;  %v83_v19 = vmax.f32 %v79_v7, 0.0 }
  0x95   :  { %114 = dma.vmem_to_hbm [thread:$0]  %s110_s28, 128, %s112_s5, [#allocation4]  }
  0x96   :  { %v85_v9 = vsub.f32 0.0, %v84_v8 }
  0x98   :  { %v86_v10 = vmul.f32 1.442695, %v85_v9 }
  0x9a   :  { %147 = vpow2.f32 %v86_v10 }
  0xa0   :  { %v148_v11 = vpop.eup %147 }
  0xa1   :  { %v88_v12 = vadd.f32 1.0, %v148_v11  ;;  %v91_v13 = vmul.f32 -0.5, %v148_v11  ;;  %v94_v15 = vand.u32 2147483647, %v148_v11 }
  0xa3   :  { %149 = vlog2.f32 %v88_v12  ;;  %v92_v14 = vadd.f32 1.0, %v91_v13  ;;  %vm95_vm2 = vcmp.lt.f32.partialorder %v94_v15, 0.0004427343 }
  0xa5   :  { %v93_v18 = vmul.f32 %v148_v11, %v92_v14 }
  0xa9   :  { %v150_v16 = vpop.eup %149 }
  0xaa   :  { %v90_v17 = vmul.f32 0.6931472, %v150_v16 }
  0xac   :  { %v96_v20 = vsel %vm95_vm2, %v93_v18, %v90_v17 }
  0xad   :  { %v97_v21 = vadd.f32 %v96_v20, %v83_v19 }
  0xaf   :  { %v98_v22 = vadd.f32 1e-06, %v97_v21 }
  0xb1   :  { %100 = vrot.lane.b32.xlu0 %v98_v22, %s260_s2 }
 0x123   :  { %v101_v23 = vpop.permute.xlu0 %100 }
 0x124   :  { %103 = vst.msk [vmem:[#allocation8] sm:$0xff] %vm81_vm1, %v101_v23 }
 0x125   :  { %125 = dma.vmem_to_hbm [thread:$0]  %s121_s7, 128, %s123_s3, [#allocation9]  }
 0x126   :  { %251 = dma.done.wait [#allocation4], 128  }
 0x127   :  { %252 = vsyncadd [#allocation4], 4294967168 }
 0x128   :  { %253 = dma.done.wait [#allocation9], 128  }
 0x129   :  { %254 = vsyncadd [#allocation9], 4294967168 }
 0x12a   :  { %134 = vsyncpa [#allocation3], 1 }
 0x12b   :  { %135 = vsyncpa [#allocation6], 1 }
 0x12c   :  { %136 = vsyncpa [#allocation4], 1 }
 0x12d   :  { %137 = vsyncpa [#allocation9], 1 }

</bundles_post_ra>
